<compile_context>
chip_gen: v7x
topology: tpu7x:2x2x1
jax: 0.10.0
libtpu: 0.0.40
codegen_flags: <defaults>
</compile_context>

<pallas_src>
import jax
import jax.numpy as jnp
from jax.experimental import pallas as pl
from jax.experimental.pallas import tpu as pltpu


def _round_up(x, m):
    return (x + m - 1) // m * m


def _mac_kernel(x_ref, w_ref, b_ref, o_ref, acc_ref):
    # x_ref: (TB, C, T_HW)   w_ref: (C, OUT)   b_ref: (1, OUT)
    # o_ref: (TB, OUT)       acc_ref: (TB, C) f32 scratch (running max)
    k = pl.program_id(1)  # HW reduction axis (innermost grid axis)

    @pl.when(k == 0)
    def _init():
        acc_ref[...] = jnp.full(acc_ref.shape, -jnp.inf, dtype=acc_ref.dtype)

    # Per-tile max over the spatial lanes. Reduce in the input dtype (exact for
    # max) and upcast only the small (TB, C) result — no full-tile f32 copy.
    part = jnp.max(x_ref[...], axis=-1).astype(acc_ref.dtype)  # (TB, C)
    acc_ref[...] = jnp.maximum(acc_ref[...], part)

    @pl.when(k == pl.num_programs(1) - 1)
    def _finalize():
        pooled = acc_ref[...]                                   # (TB, C) f32
        out = jnp.dot(pooled, w_ref[...].astype(jnp.float32),
                      preferred_element_type=jnp.float32)       # (TB, OUT)
        out = out + b_ref[...].astype(jnp.float32)
        o_ref[...] = out.astype(o_ref.dtype)


def mac_forward(x_nchw, weight, bias):
    """MAC forward pass: max over spatial dims, then Linear.

    x_nchw: (B, C, H, W); weight: (OUT, C) (PyTorch convention); bias: (OUT,).
    Returns (B, OUT).
    """
    b, c, h, w = x_nchw.shape
    out_ch = weight.shape[0]
    hw = h * w
    itemsize = jnp.dtype(x_nchw.dtype).itemsize

    # ---- tiling decisions -------------------------------------------------
    # Batch tile: split batch only when large and divisible by 8 (keeps the
    # output/accumulator sublane dim legal; gives the "parallel" axis real
    # blocks to shard across TensorCores on multi-TC chips).
    tb = 8 if (b > 8 and b % 8 == 0) else b
    grid_b = b // tb

    # HW tile: multiple of 128 lanes, target <= 1024 lanes, and keep the
    # double-buffered x tile comfortably inside VMEM on every generation.
    x_tile_budget = 24 * 1024 * 1024  # bytes for the 2x double-buffered x tile
    hw_pad_base = _round_up(hw, 128)
    if hw_pad_base <= 1024 and 2 * tb * c * hw_pad_base * itemsize <= x_tile_budget:
        t_hw = hw_pad_base
    else:
        t_hw = 512
        while t_hw > 128 and 2 * tb * c * t_hw * itemsize > x_tile_budget:
            t_hw //= 2
    hw_padded = _round_up(hw, t_hw)
    grid_hw = hw_padded // t_hw

    # ---- layout / padding ---------------------------------------------------
    x_flat = x_nchw.reshape(b, c, hw)  # free, contiguous reshape
    if hw_padded != hw:
        # Pad spatial positions with the dtype minimum so the max is unchanged.
        if jnp.issubdtype(x_flat.dtype, jnp.floating):
            pad_val = jnp.finfo(x_flat.dtype).min
        else:
            pad_val = jnp.iinfo(x_flat.dtype).min
        x_flat = jnp.pad(x_flat, ((0, 0), (0, 0), (0, hw_padded - hw)),
                         constant_values=pad_val)

    w_t = weight.T                   # (C, OUT), stays resident in VMEM
    b2d = bias.reshape(1, out_ch)    # (1, OUT)

    # ---- VMEM / scheduler hints --------------------------------------------
    vmem_est = (2 * tb * c * t_hw * itemsize                          # x (2 bufs)
                + c * out_ch * jnp.dtype(w_t.dtype).itemsize           # weight
                + out_ch * jnp.dtype(b2d.dtype).itemsize               # bias
                + 2 * tb * out_ch * itemsize                           # out (2 bufs)
                + tb * c * 4)                                          # f32 acc
    vmem_limit = int(min(48 * 1024 * 1024, max(2 * vmem_est, 16 * 1024 * 1024)))

    cost = pl.CostEstimate(
        flops=b * c * hw + 2 * b * c * out_ch,
        transcendentals=0,
        bytes_accessed=(b * c * hw_padded * itemsize
                        + c * out_ch * jnp.dtype(w_t.dtype).itemsize
                        + b * out_ch * itemsize),
    )

    return pl.pallas_call(
        _mac_kernel,
        out_shape=jax.ShapeDtypeStruct((b, out_ch), x_nchw.dtype),
        grid_spec=pltpu.PrefetchScalarGridSpec(
            num_scalar_prefetch=0,
            grid=(grid_b, grid_hw),
            in_specs=[
                pl.BlockSpec((tb, c, t_hw), lambda ib, k: (ib, 0, k)),
                pl.BlockSpec((c, out_ch), lambda ib, k: (0, 0)),
                pl.BlockSpec((1, out_ch), lambda ib, k: (0, 0)),
            ],
            out_specs=pl.BlockSpec((tb, out_ch), lambda ib, k: (ib, 0)),
            scratch_shapes=[pltpu.VMEM((tb, c), jnp.float32)],
        ),
        compiler_params=pltpu.CompilerParams(
            dimension_semantics=("parallel", "arbitrary"),
            vmem_limit_bytes=vmem_limit),
        cost_estimate=cost,
    )(x_flat, w_t, b2d)


# TODO(synk): the optional `num_cls is not None` branch (extra cls_layer Linear
# on the pooled features) is not implemented; this covers the default
# num_cls=None forward path (max-pool + Linear).


def mac_reference(x_nchw, weight, bias):
    b, c, h, w = x_nchw.shape
    pooled = jnp.max(x_nchw.reshape(b, c, -1), axis=-1)
    return pooled @ weight.T + bias


if __name__ == "__main__":
    key = jax.random.PRNGKey(0)
    k_x, k_w, k_b = jax.random.split(key, 3)

    B, C, H, W = 2, 4, 16, 16
    OUT = 8

    x = jax.random.normal(k_x, (B, C, H, W), dtype=jnp.float32)
    # Deterministic "Linear" parameters (PyTorch shapes: weight (OUT, C), bias (OUT,))
    weight = jax.random.normal(k_w, (OUT, C), dtype=jnp.float32) * 0.1
    bias = jax.random.normal(k_b, (OUT,), dtype=jnp.float32) * 0.1

    out = mac_forward(x, weight, bias)
    out = jax.block_until_ready(out)

    ref = mac_reference(x, weight, bias)
    assert out.shape == (B, OUT)
    assert jnp.allclose(out, ref, atol=1e-5, rtol=1e-5), (out, ref)

    print("KERNEL_OK")
</pallas_src>

<mosaic_0001>
module attributes {stable_mosaic.version = 11 : i64} {
  func.func @_mac_kernel(%arg0: i32, %arg1: i32, %arg2: memref<2x4x256xf32, #tpu.memory_space<vmem>>, %arg3: memref<4x8xf32, #tpu.memory_space<vmem>>, %arg4: memref<1x8xf32, #tpu.memory_space<vmem>>, %arg5: memref<2x8xf32, #tpu.memory_space<vmem>>, %arg6: memref<2x4xf32, #tpu.memory_space<vmem>>) attributes {dimension_semantics = [#tpu.dimension_semantics<parallel>, #tpu.dimension_semantics<arbitrary>], iteration_bounds = array<i64: 1, 1>, scalar_prefetch = 0 : i64, scratch_operands = 1 : i64, tpu.core_type = #tpu.core_type<tc>, window_params = [{transform_indices = @transform_0, window_bounds = array<i64: 2, 4, 256>}, {pipeline_mode = #tpu.pipeline_mode<synchronous>, transform_indices = @transform_1, window_bounds = array<i64: 4, 8>}, {pipeline_mode = #tpu.pipeline_mode<synchronous>, transform_indices = @transform_2, window_bounds = array<i64: 1, 8>}, {transform_indices = @transform_3, window_bounds = array<i64: 2, 8>}]} {
    %c0_i32 = arith.constant 0 : i32
    %0 = arith.cmpi eq, %arg1, %c0_i32 : i32
    %1 = arith.extui %0 : i1 to i32
    %c0_i32_0 = arith.constant 0 : i32
    %2 = arith.cmpi ne, %1, %c0_i32_0 : i32
    scf.if %2 {
      %cst_9 = arith.constant 0xFF800000 : f32
      %11 = vector.broadcast %cst_9 : f32 to vector<2x4xf32>
      %c0_10 = arith.constant 0 : index
      %c0_11 = arith.constant 0 : index
      %12 = vector.load %arg6[%c0_10, %c0_11] : memref<2x4xf32, #tpu.memory_space<vmem>>, vector<2x4xf32>
      tpu.vector_store %arg6[%c0_10, %c0_11], %11 {strides = array<i32>} : memref<2x4xf32, #tpu.memory_space<vmem>>, vector<2x4xf32>,
    } else {
    }
    %c0 = arith.constant 0 : index
    %c0_1 = arith.constant 0 : index
    %c0_2 = arith.constant 0 : index
    %3 = vector.load %arg2[%c0, %c0_1, %c0_2] : memref<2x4x256xf32, #tpu.memory_space<vmem>>, vector<2x4x256xf32>
    %cst = arith.constant dense<0xFF800000> : vector<2x4xf32>
    %4 = vector.multi_reduction <maximumf>, %3, %cst [2] : vector<2x4x256xf32> to vector<2x4xf32>
    %c0_3 = arith.constant 0 : index
    %c0_4 = arith.constant 0 : index
    %5 = vector.load %arg6[%c0_3, %c0_4] : memref<2x4xf32, #tpu.memory_space<vmem>>, vector<2x4xf32>
    %6 = arith.maximumf %5, %4 : vector<2x4xf32>
    %c0_5 = arith.constant 0 : index
    %c0_6 = arith.constant 0 : index
    %7 = vector.load %arg6[%c0_5, %c0_6] : memref<2x4xf32, #tpu.memory_space<vmem>>, vector<2x4xf32>
    tpu.vector_store %arg6[%c0_5, %c0_6], %6 {strides = array<i32>} : memref<2x4xf32, #tpu.memory_space<vmem>>, vector<2x4xf32>,
    %c0_i32_7 = arith.constant 0 : i32
    %8 = arith.cmpi eq, %arg1, %c0_i32_7 : i32
    %9 = arith.extui %8 : i1 to i32
    %c0_i32_8 = arith.constant 0 : i32
    %10 = arith.cmpi ne, %9, %c0_i32_8 : i32
    scf.if %10 {
      %c0_9 = arith.constant 0 : index
      %c0_10 = arith.constant 0 : index
      %11 = vector.load %arg6[%c0_9, %c0_10] : memref<2x4xf32, #tpu.memory_space<vmem>>, vector<2x4xf32>
      %c0_11 = arith.constant 0 : index
      %c0_12 = arith.constant 0 : index
      %12 = vector.load %arg3[%c0_11, %c0_12] : memref<4x8xf32, #tpu.memory_space<vmem>>, vector<4x8xf32>
      %cst_13 = arith.constant dense<0.000000e+00> : vector<2x8xf32>
      %13 = tpu.matmul %11, %12, %cst_13 {dimension_numbers = #tpu.dot_dimension_numbers<[1], [0], [0], [1], [0, 0, 1, 1], [], []>} : vector<2x4xf32>, vector<4x8xf32>, vector<2x8xf32> -> vector<2x8xf32>
      %c0_14 = arith.constant 0 : index
      %c0_15 = arith.constant 0 : index
      %14 = vector.load %arg4[%c0_14, %c0_15] : memref<1x8xf32, #tpu.memory_space<vmem>>, vector<1x8xf32>
      %15 = vector.broadcast %14 : vector<1x8xf32> to vector<2x8xf32>
      %16 = arith.addf %13, %15 : vector<2x8xf32>
      %c0_16 = arith.constant 0 : index
      %c0_17 = arith.constant 0 : index
      %17 = vector.load %arg5[%c0_16, %c0_17] : memref<2x8xf32, #tpu.memory_space<vmem>>, vector<2x8xf32>
      tpu.vector_store %arg5[%c0_16, %c0_17], %16 {strides = array<i32>} : memref<2x8xf32, #tpu.memory_space<vmem>>, vector<2x8xf32>,
    } else {
    }
    return
  }
  func.func @transform_0(%arg0: i32, %arg1: i32) -> (i32, i32, i32) {
    %c0_i32 = arith.constant 0 : i32
    %c0_i32_0 = arith.constant 0 : i32
    return %arg0, %c0_i32, %arg1 : i32, i32, i32
  }
  func.func @transform_1(%arg0: i32, %arg1: i32) -> (i32, i32) {
    %c0_i32 = arith.constant 0 : i32
    %c0_i32_0 = arith.constant 0 : i32
    %c0_i32_1 = arith.constant 0 : i32
    return %c0_i32, %c0_i32_0 : i32, i32
  }
  func.func @transform_2(%arg0: i32, %arg1: i32) -> (i32, i32) {
    %c0_i32 = arith.constant 0 : i32
    %c0_i32_0 = arith.constant 0 : i32
    %c0_i32_1 = arith.constant 0 : i32
    return %c0_i32, %c0_i32_0 : i32, i32
  }
  func.func @transform_3(%arg0: i32, %arg1: i32) -> (i32, i32) {
    %c0_i32 = arith.constant 0 : i32
    %c0_i32_0 = arith.constant 0 : i32
    return %arg0, %c0_i32 : i32, i32
  }
}

</mosaic_0001>

<bundles_post_ra>
// kernel: tpu_custom_call.1
= control target key start
LH: loop header
LB: loop body
LE: loop exit
PB: predicated region body
PF: predicated region fallthrough
CT: control target
= control target key end

     0   :  { %8 = vsyncpa [#allocation4], 0  ;;  %s358_s0 = inlined_call_operand.hbm [shape: f32[2,4,256], index: 0, kind: input, shape index: {}]   ;;  %s359_s1 = inlined_call_operand.hbm [shape: f32[4,8], index: 1, kind: input, shape index: {}]   ;;  %s360_s2 = inlined_call_operand.vmem [shape: f32[1,8], index: 2, kind: input, shape index: {}]   ;;  %s361_s3 = inlined_call_operand.hbm [shape: f32[2,8], index: 3, kind: output, shape index: {}]  }
   0x1   :  { %9 = vsyncpa [#allocation7], 0 }
   0x2   :  { %10 = vsyncpa [#allocation5], 0  ;;  %s284_s12 = smov [#allocation3]   ;;  %s212_s16 = scalar_lea.hbm %s358_s0, 256 }
   0x3   :  { %s16_s13 = sshll.u32 %s284_s12, 4  ;;  %p213_p0 = scmp.ne.s32.totalorder %s358_s0, %s212_s16  ;;  %s17_s13 = int_to_ptr.vmem [resolvable:$true] %s16_s13 }
   0x4   :  { %p216_p1 = scmp.lt.u32.totalorder %s212_s16, %s358_s0 }
   0x6   :  { %p218_p2 = pnand %p216_p1, %p213_p0 }
   0x8   :  { %221 = shalt.err (!%p218_p2)
}
   0x9   :  { %s222_s21 = scalar_lea.vmem %s17_s13, 256  ;;  %p227_p4 = scmp.lt.s32.totalorder %s17_s13, %s17_s13 }
   0xa   :  { %p223_p3 = scmp.ne.s32.totalorder %s17_s13, %s222_s21  ;;  %p228_p5 = scmp.lt.s32.totalorder %s222_s21, %s222_s21 }
   0xc   :  { %p229_p6 = por %p228_p5, %p227_p4 }
   0xe   :  { %p230_p7 = pnand %p229_p6, %p223_p3 }
  0x10   :  { %233 = shalt.err (!%p230_p7)
}
  0x11   :  { %s285_s22 = smov 128   ;;  %s286_s23 = smov 8  }
  0x12   :  { %22 = dma.hbm_to_vmem [thread:$0]  %s358_s0, 256, %s17_s13, [#allocation4], %s285_s22, %s285_s22, %s286_s23  }
  0x13   :  { %s287_s26 = smov [#allocation6]   ;;  %s234_s30 = scalar_lea.hbm %s359_s1, 64 }
  0x14   :  { %s29_s27 = sshll.u32 %s287_s26, 4  ;;  %p235_p8 = scmp.ne.s32.totalorder %s359_s1, %s234_s30  ;;  %s30_s27 = int_to_ptr.vmem [resolvable:$true] %s29_s27 }
  0x15   :  { %p238_p9 = scmp.lt.u32.totalorder %s234_s30, %s359_s1 }
  0x17   :  { %p240_p10 = pnand %p238_p9, %p235_p8 }
  0x19   :  { %243 = shalt.err (!%p240_p10)
}
  0x1a   :  { %s244_s8 = scalar_lea.vmem %s30_s27, 64  ;;  %p249_p12 = scmp.lt.s32.totalorder %s30_s27, %s30_s27 }
  0x1b   :  { %p245_p11 = scmp.ne.s32.totalorder %s30_s27, %s244_s8  ;;  %p250_p13 = scmp.lt.s32.totalorder %s244_s8, %s244_s8 }
  0x1d   :  { %p251_p0 = por %p250_p13, %p249_p12 }
  0x1f   :  { %p252_p1 = pnand %p251_p0, %p245_p11 }
  0x21   :  { %255 = shalt.err (!%p252_p1)
}
  0x22   :  { %32 = dma.hbm_to_vmem [thread:$0]  %s359_s1, 64, %s30_s27, [#allocation7]  }
  0x23   :  { %278 = dma.done.wait [#allocation4], 256  }
  0x24   :  { %279 = vsyncadd [#allocation4], 4294967040 }
  0x25   :  { %280 = dma.done.wait [#allocation7], 64  }
  0x26   :  { %281 = vsyncadd [#allocation7], 4294967232  ;;  %vm55_vm0 = vcmask 1043456   ;;  %v47_v0 = vld [vmem:[#allocation3] sm:$0xff]  ;;  %v48_v1 = vld [vmem:[#allocation3 + $0x8] sm:$0xff]  ;;  %vm45_vm1 = vcmask 25600   ;;  %v69_v13 = vlaneseq }
  0x27   :  { %v51_v2 = vcombine.high %v47_v0, %v47_v0  ;;  %v56_v3 = vsel %vm55_vm0, %v47_v0, -inf  ;;  %v52_v4 = vcombine.high %v48_v1, %v48_v1  ;;  %v61_v6 = vsel %vm55_vm0, %v48_v1, -inf  ;;  %v89_v11 = vld [vmem:[#allocation6] sm:$0xf]  ;;  %v192_v25 = vld [vmem:[%s360_s2] ss:$0 sm:$0xff] }
  0x28   :  { %v288_v10 = vmov -inf   ;;  %v289_v12 = vmov 0.0   ;;  %vm290_vm2 = vmmov 0   ;;  %v70_v14 = vand.u32 127, %v69_v13  ;;  %s291_s11 = smov [#allocation8]  }
  0x29   :  { %v57_v5 = vsel %vm55_vm0, %v51_v2, -inf  ;;  %v62_v7 = vsel %vm55_vm0, %v52_v4, -inf  ;;  %46 = vst.msk [vmem:[#allocation2] sm:$0x3] %vm45_vm1, %v288_v10  ;;  %197 = vmatprep.subr.mxu0 %v289_v12  ;;  %199 = vmatprep.mubr.msk.f32.mxu0 %vm290_vm2, %v289_v12  ;;  %v72_v15 = vshrl.u32 %v69_v13, 7  ;;  %vm79_vm3 = vcmask 1041409  }
  0x2a   :  { %v58_v8 = vmax.f32 %v56_v3, %v57_v5  ;;  %v63_v9 = vmax.f32 %v61_v6, %v62_v7  ;;  %198 = vmatpush3.msk.msra.mxu0 %vm55_vm0, %v89_v11  ;;  %vm97_vm4 = vcmask 31744   ;;  %s182_s12 = sshll.u32 %s291_s11, 4  ;;  %vm174_vm5 = vcmask 58368   ;;  %s183_s12 = int_to_ptr.vmem [resolvable:$true] %s182_s12 }
  0x2b   :  { %v73_v17 = vsub.s32 %v70_v14, %v72_v15  ;;  %s256_s13 = scalar_lea.vmem %s183_s12, 32  ;;  %p261_p3 = scmp.lt.s32.totalorder %s183_s12, %s183_s12 }
  0x2c   :  { %59 = vmax.xlane.f32.xlu0 %v58_v8  ;;  %p257_p2 = scmp.ne.s32.totalorder %s183_s12, %s256_s13  ;;  %p262_p4 = scmp.lt.s32.totalorder %s256_s13, %s256_s13 }
  0x2e   :  { %p263_p5 = por %p262_p4, %p261_p3 }
  0x30   :  { %64 = vmax.xlane.f32.xlu0 %v63_v9  ;;  %v66_v20 = vld [vmem:[#allocation2] sm:$0x3]  ;;  %p264_p6 = pnand %p263_p5, %p257_p2 }
  0xb9   :  { %v60_v16 = vpop.xlane.xlu0 %59 }
  0xba   :  { %v74_v19 = vrot.slane %v60_v16, %v73_v17 }
  0xbd   :  { %v65_v18 = vpop.xlane.xlu0 %64 }
  0xbe   :  { %v78_v21 = vrot.slane %v65_v18, %v73_v17 }
  0xc0   :  { %v80_v22 = vsel %vm79_vm3, %v78_v21, %v74_v19 }
  0xc1   :  { %v82_v23 = vmax.f32 %v66_v20, %v80_v22 }
  0xc3   :  { %84 = vst.msk [vmem:[#allocation2] sm:$0x3] %vm45_vm1, %v82_v23 }
  0xca   :  { %v88_v24 = vld [vmem:[#allocation2] sm:$0x3] }
  0xcb   :  { %200 = vmatmul.mubr.msk.f32.vlgmr.msra.gmra.mrb[0].mxu0 %vm97_vm4, %v88_v24 }
 0x19e   :  { %v170_v26 = vpop.f32.mrb[0].mxu0 }
 0x19f   :  { %v171_v27 = vadd.f32 %v192_v25, %v170_v26  ;;  %v201_v28 = vpop.f32.mrb[1].mxu0 }
 0x1a1   :  { %175 = vst.msk [vmem:[#allocation8] sm:$0x3] %vm174_vm5, %v171_v27 }
 0x1a2   :  { %267 = shalt.err (!%p264_p6)
}
 0x1a3   :  { %s268_s16 = scalar_lea.hbm %s361_s3, 32 }
 0x1a4   :  { %p269_p7 = scmp.ne.s32.totalorder %s361_s3, %s268_s16  ;;  %p272_p8 = scmp.lt.u32.totalorder %s268_s16, %s361_s3 }
 0x1a6   :  { %p274_p9 = pnand %p272_p8, %p269_p7 }
 0x1a8   :  { %277 = shalt.err (!%p274_p9)
}
 0x1a9   :  { %185 = dma.vmem_to_hbm [thread:$0]  %s183_s12, 32, %s361_s3, [#allocation5]  }
 0x1aa   :  { %282 = dma.done.wait [#allocation5], 32  }
 0x1ab   :  { %283 = vsyncadd [#allocation5], 4294967264 }
 0x1ac   :  { %189 = vsyncpa [#allocation4], 1 }
 0x1ad   :  { %190 = vsyncpa [#allocation7], 1 }
 0x1ae   :  { %191 = vsyncpa [#allocation5], 1 }

</bundles_post_ra>
